<compile_context>
chip_gen: v7x
topology: tpu7x:2x2x1
jax: 0.10.0
libtpu: 0.0.40
codegen_flags: <defaults>
</compile_context>

<pallas_src>
import functools
import math

import jax
import jax.numpy as jnp
import numpy as np
from jax import lax
from jax.experimental import pallas as pl
from jax.experimental.pallas import tpu as pltpu

LANES = 128
_VMEM_LIMIT_BYTES = 32 * 1024 * 1024
_WEIGHT_VMEM_BUDGET = 4 * 1024 * 1024


def _conv_stats_kernel(p_ref, w_ref, conv_ref, stats_ref):
    """Phase 1: single im2col matmul + per-tile, per-lane partial BN statistics.

    p_ref:     (BR, lane_pack*K)  packed im2col rows (lane_pack rows fused per packed row)
    w_ref:     (lane_pack*K, P)   block-diagonal conv weights, P = lane_pack*Cout
    conv_ref:  (BR, P)            lane-dense conv output tile
    stats_ref: (1, 2, P)          per-tile per-lane [sum, sum_of_squares]
    """
    acc = jnp.dot(p_ref[...], w_ref[...], preferred_element_type=jnp.float32)
    conv_ref[...] = acc
    s1 = jnp.sum(acc, axis=0, keepdims=True)          # (1, P)
    s2 = jnp.sum(acc * acc, axis=0, keepdims=True)    # (1, P)
    stats_ref[...] = jnp.concatenate([s1, s2], axis=0)[None]


def _bn_relu_kernel(conv_ref, scale_ref, shift_ref, o_ref):
    """Phase 2: y = relu(conv * scale + shift), fully lane-dense elementwise."""
    o_ref[...] = jnp.maximum(conv_ref[...] * scale_ref[...] + shift_ref[...], 0.0)


@functools.partial(
    jax.jit,
    static_argnames=("stride", "padding", "dilation", "bn_eps", "block_rows"))
def conv_block(x_nchw, weight_oihw, gamma, beta, *,
               stride=1, padding=1, dilation=1, bn_eps=1e-5, block_rows=256):
    """ConvBlock forward. x_nchw: (N, Cin, H, W) like PyTorch; returns NCHW."""
    N, Cin, H, W = x_nchw.shape
    Cout, _, KH, KW = weight_oihw.shape
    K = KH * KW * Cin

    # Lane packing factor: fuse `lane_pack` output rows into the 128-lane dim.
    lane_pack = LANES // Cout if (Cout <= LANES and LANES % Cout == 0) else 1
    while lane_pack > 1 and (lane_pack * K) * (lane_pack * Cout) * 4 > _WEIGHT_VMEM_BUDGET:
        lane_pack //= 2
    P = lane_pack * Cout

    # ---- im2col in XLA (transpose + pad + window slices fuse under jit) ----
    # TODO(synk): for large inputs an in-kernel halo/im2col (BlockSpec over H rows) would
    #             avoid the KH*KW-fold HBM expansion of the patch matrix.
    x = jnp.transpose(x_nchw, (0, 2, 3, 1)).astype(jnp.float32)        # NHWC
    x_pad = jnp.pad(x, ((0, 0), (padding, padding), (padding, padding), (0, 0)))
    HP, WP = H + 2 * padding, W + 2 * padding
    Ho = (HP - dilation * (KH - 1) - 1) // stride + 1
    Wo = (WP - dilation * (KW - 1) - 1) // stride + 1
    rows = N * Ho * Wo

    taps = []
    for kh in range(KH):
        for kw in range(KW):
            h0 = kh * dilation
            w0 = kw * dilation
            taps.append(x_pad[:,
                              h0:h0 + stride * (Ho - 1) + 1:stride,
                              w0:w0 + stride * (Wo - 1) + 1:stride,
                              :])
    patches = jnp.concatenate(taps, axis=-1).reshape(rows, K)          # (rows, KH*KW*Cin)

    # Pad the row dim so the grid tiles evenly; zero rows contribute 0 to sum/sumsq.
    row_quant = 8 * lane_pack
    block_rows = max(row_quant, (block_rows // row_quant) * row_quant)
    rows_pad = int(math.ceil(rows / block_rows)) * block_rows
    if rows_pad != rows:
        patches = jnp.pad(patches, ((0, rows_pad - rows), (0, 0)))
    num_tiles = rows_pad // block_rows
    br = block_rows // lane_pack                     # packed rows per tile
    packed_rows = rows_pad // lane_pack
    K_big = lane_pack * K

    patches_packed = patches.reshape(packed_rows, K_big)

    # Weights: OIHW -> (KH*KW*Cin, Cout) matching the (kh, kw, cin) tap order, then a
    # block-diagonal expansion so one matmul yields the lane-packed output directly.
    # TODO(synk): groups > 1, conv bias, 4-tuple ZeroPad2d padding and non-ReLU activations
    #             are not implemented (module defaults: groups=1, bias=False, ReLU).
    w_mat = jnp.transpose(weight_oihw, (2, 3, 1, 0)).astype(jnp.float32).reshape(K, Cout)
    w_big = jnp.kron(jnp.eye(lane_pack, dtype=jnp.float32), w_mat)     # (K_big, P)

    cparams = pltpu.CompilerParams(dimension_semantics=("parallel",),
                                   vmem_limit_bytes=_VMEM_LIMIT_BYTES)

    # ---- Phase 1: conv + partial stats, tiled over packed rows ----
    conv_packed, stats = pl.pallas_call(
        _conv_stats_kernel,
        out_shape=(jax.ShapeDtypeStruct((packed_rows, P), jnp.float32),
                   jax.ShapeDtypeStruct((num_tiles, 2, P), jnp.float32)),
        grid=(num_tiles,),
        in_specs=[pl.BlockSpec((br, K_big), lambda i: (i, 0)),
                  pl.BlockSpec((K_big, P), lambda i: (0, 0))],
        out_specs=(pl.BlockSpec((br, P), lambda i: (i, 0)),
                   pl.BlockSpec((1, 2, P), lambda i: (i, 0, 0))),
        compiler_params=cparams,
    )(patches_packed, w_big)

    # ---- Global BN batch statistics (biased variance) folded into one affine ----
    # TODO(synk): running_mean/running_var buffer updates of nn.BatchNorm2d not reproduced.
    count = jnp.float32(rows)
    lane_sum = jnp.sum(stats[:, 0, :], axis=0).reshape(lane_pack, Cout)
    lane_sq = jnp.sum(stats[:, 1, :], axis=0).reshape(lane_pack, Cout)
    mean = jnp.sum(lane_sum, axis=0) / count
    var = jnp.maximum(jnp.sum(lane_sq, axis=0) / count - mean * mean, 0.0)
    scale = gamma.astype(jnp.float32) * lax.rsqrt(var + bn_eps)        # (Cout,)
    shift = beta.astype(jnp.float32) - mean * scale                    # (Cout,)
    scale_l = jnp.tile(scale, lane_pack).reshape(1, P)
    shift_l = jnp.tile(shift, lane_pack).reshape(1, P)

    # ---- Phase 2: normalize + ReLU, lane-dense elementwise, tiled & parallel ----
    out_packed = pl.pallas_call(
        _bn_relu_kernel,
        out_shape=jax.ShapeDtypeStruct((packed_rows, P), jnp.float32),
        grid=(num_tiles,),
        in_specs=[pl.BlockSpec((br, P), lambda i: (i, 0)),
                  pl.BlockSpec((1, P), lambda i: (0, 0)),
                  pl.BlockSpec((1, P), lambda i: (0, 0))],
        out_specs=pl.BlockSpec((br, P), lambda i: (i, 0)),
        compiler_params=cparams,
    )(conv_packed, scale_l, shift_l)

    out = out_packed.reshape(rows_pad, Cout)[:rows].reshape(N, Ho, Wo, Cout)
    return jnp.transpose(out, (0, 3, 1, 2))


def conv_block_reference(x_nchw, weight_oihw, gamma, beta, *,
                         stride=1, padding=1, dilation=1, bn_eps=1e-5):
    """Pure-JAX reference (same math) for correctness checking."""
    x = jnp.transpose(x_nchw, (0, 2, 3, 1)).astype(jnp.float32)
    w = jnp.transpose(weight_oihw, (2, 3, 1, 0)).astype(jnp.float32)
    y = lax.conv_general_dilated(
        x, w,
        window_strides=(stride, stride),
        padding=[(padding, padding), (padding, padding)],
        rhs_dilation=(dilation, dilation),
        dimension_numbers=("NHWC", "HWIO", "NHWC"))
    mean = jnp.mean(y, axis=(0, 1, 2), keepdims=True)
    var = jnp.mean((y - mean) ** 2, axis=(0, 1, 2), keepdims=True)
    yn = (y - mean) * lax.rsqrt(var + bn_eps)
    yn = yn * gamma.reshape(1, 1, 1, -1) + beta.reshape(1, 1, 1, -1)
    yn = jnp.maximum(yn, 0.0)
    return jnp.transpose(yn, (0, 3, 1, 2))


if __name__ == "__main__":
    # Small shapes consistent with ConvBlock(in=4, out=8, k=3, stride=1, pad=1).
    N, Cin, H, W = 2, 4, 16, 16
    Cout, KH, KW = 8, 3, 3

    key = jax.random.PRNGKey(0)
    kx, kw, kg, kb = jax.random.split(key, 4)

    x = jax.random.normal(kx, (N, Cin, H, W), dtype=jnp.float32)
    fan_in = Cin * KH * KW
    weight = jax.random.uniform(kw, (Cout, Cin, KH, KW), dtype=jnp.float32,
                                minval=-1.0, maxval=1.0) / np.sqrt(fan_in)
    gamma = 1.0 + 0.1 * jax.random.normal(kg, (Cout,), dtype=jnp.float32)
    beta = 0.1 * jax.random.normal(kb, (Cout,), dtype=jnp.float32)

    out = conv_block(x, weight, gamma, beta, stride=1, padding=1,
                     dilation=1, bn_eps=1e-5)
    out = jax.block_until_ready(out)

    ref = conv_block_reference(x, weight, gamma, beta, stride=1, padding=1,
                               dilation=1, bn_eps=1e-5)
    np.testing.assert_allclose(np.asarray(out), np.asarray(ref),
                               rtol=1e-4, atol=2e-4)

    print("KERNEL_OK")
</pallas_src>

<mosaic_0001>
module attributes {stable_mosaic.version = 11 : i64} {
  func.func @_conv_stats_kernel(%arg0: i32, %arg1: memref<16x576xf32, #tpu.memory_space<vmem>>, %arg2: memref<576x128xf32, #tpu.memory_space<vmem>>, %arg3: memref<16x128xf32, #tpu.memory_space<vmem>>, %arg4: memref<1x2x128xf32, #tpu.memory_space<vmem>>) attributes {dimension_semantics = [#tpu.dimension_semantics<parallel>], iteration_bounds = array<i64: 2>, scalar_prefetch = 0 : i64, scratch_operands = 0 : i64, tpu.core_type = #tpu.core_type<tc>, window_params = [{transform_indices = @transform_0, window_bounds = array<i64: 16, 576>}, {pipeline_mode = #tpu.pipeline_mode<synchronous>, transform_indices = @transform_1, window_bounds = array<i64: 576, 128>}, {transform_indices = @transform_2, window_bounds = array<i64: 16, 128>}, {transform_indices = @transform_3, window_bounds = array<i64: 1, 2, 128>}]} {
    %c0 = arith.constant 0 : index
    %c0_0 = arith.constant 0 : index
    %0 = vector.load %arg1[%c0, %c0_0] : memref<16x576xf32, #tpu.memory_space<vmem>>, vector<16x576xf32>
    %c0_1 = arith.constant 0 : index
    %c0_2 = arith.constant 0 : index
    %1 = vector.load %arg2[%c0_1, %c0_2] : memref<576x128xf32, #tpu.memory_space<vmem>>, vector<576x128xf32>
    %cst = arith.constant dense<0.000000e+00> : vector<16x128xf32>
    %2 = tpu.matmul %0, %1, %cst {dimension_numbers = #tpu.dot_dimension_numbers<[1], [0], [0], [1], [0, 0, 1, 1], [], []>} : vector<16x576xf32>, vector<576x128xf32>, vector<16x128xf32> -> vector<16x128xf32>
    %c0_3 = arith.constant 0 : index
    %c0_4 = arith.constant 0 : index
    %3 = vector.load %arg3[%c0_3, %c0_4] : memref<16x128xf32, #tpu.memory_space<vmem>>, vector<16x128xf32>
    tpu.vector_store %arg3[%c0_3, %c0_4], %2 {strides = array<i32>} : memref<16x128xf32, #tpu.memory_space<vmem>>, vector<16x128xf32>,
    %cst_5 = arith.constant dense<0.000000e+00> : vector<128xf32>
    %4 = vector.multi_reduction <add>, %2, %cst_5 [0] : vector<16x128xf32> to vector<128xf32>
    %5 = vector.shape_cast %4 : vector<128xf32> to vector<1x128xf32>
    %6 = arith.mulf %2, %2 : vector<16x128xf32>
    %cst_6 = arith.constant dense<0.000000e+00> : vector<128xf32>
    %7 = vector.multi_reduction <add>, %6, %cst_6 [0] : vector<16x128xf32> to vector<128xf32>
    %8 = vector.shape_cast %7 : vector<128xf32> to vector<1x128xf32>
    %9 = tpu.concatenate %5, %8 in 0 : vector<1x128xf32>, vector<1x128xf32> -> vector<2x128xf32>
    %10 = vector.shape_cast %9 : vector<2x128xf32> to vector<1x2x128xf32>
    %c0_7 = arith.constant 0 : index
    %c0_8 = arith.constant 0 : index
    %c0_9 = arith.constant 0 : index
    %11 = vector.load %arg4[%c0_7, %c0_8, %c0_9] : memref<1x2x128xf32, #tpu.memory_space<vmem>>, vector<1x2x128xf32>
    tpu.vector_store %arg4[%c0_7, %c0_8, %c0_9], %10 {strides = array<i32>} : memref<1x2x128xf32, #tpu.memory_space<vmem>>, vector<1x2x128xf32>,
    return
  }
  func.func @transform_0(%arg0: i32) -> (i32, i32) {
    %c0_i32 = arith.constant 0 : i32
    %c0_i32_0 = arith.constant 0 : i32
    return %arg0, %c0_i32 : i32, i32
  }
  func.func @transform_1(%arg0: i32) -> (i32, i32) {
    %c0_i32 = arith.constant 0 : i32
    %c0_i32_0 = arith.constant 0 : i32
    %c0_i32_1 = arith.constant 0 : i32
    return %c0_i32, %c0_i32_0 : i32, i32
  }
  func.func @transform_2(%arg0: i32) -> (i32, i32) {
    %c0_i32 = arith.constant 0 : i32
    %c0_i32_0 = arith.constant 0 : i32
    return %arg0, %c0_i32 : i32, i32
  }
  func.func @transform_3(%arg0: i32) -> (i32, i32, i32) {
    %c0_i32 = arith.constant 0 : i32
    %c0_i32_0 = arith.constant 0 : i32
    %c0_i32_1 = arith.constant 0 : i32
    return %arg0, %c0_i32, %c0_i32_0 : i32, i32, i32
  }
}

module attributes {stable_mosaic.version = 11 : i64} {
  func.func @_bn_relu_kernel(%arg0: i32, %arg1: memref<16x128xf32, #tpu.memory_space<vmem>>, %arg2: memref<1x128xf32, #tpu.memory_space<vmem>>, %arg3: memref<1x128xf32, #tpu.memory_space<vmem>>, %arg4: memref<16x128xf32, #tpu.memory_space<vmem>>) attributes {dimension_semantics = [#tpu.dimension_semantics<parallel>], iteration_bounds = array<i64: 2>, scalar_prefetch = 0 : i64, scratch_operands = 0 : i64, tpu.core_type = #tpu.core_type<tc>, window_params = [{transform_indices = @transform_0, window_bounds = array<i64: 16, 128>}, {pipeline_mode = #tpu.pipeline_mode<synchronous>, transform_indices = @transform_1, window_bounds = array<i64: 1, 128>}, {pipeline_mode = #tpu.pipeline_mode<synchronous>, transform_indices = @transform_2, window_bounds = array<i64: 1, 128>}, {transform_indices = @transform_3, window_bounds = array<i64: 16, 128>}]} {
    %c0 = arith.constant 0 : index
    %c0_0 = arith.constant 0 : index
    %0 = vector.load %arg1[%c0, %c0_0] : memref<16x128xf32, #tpu.memory_space<vmem>>, vector<16x128xf32>
    %c0_1 = arith.constant 0 : index
    %c0_2 = arith.constant 0 : index
    %1 = vector.load %arg2[%c0_1, %c0_2] : memref<1x128xf32, #tpu.memory_space<vmem>>, vector<1x128xf32>
    %2 = vector.broadcast %1 : vector<1x128xf32> to vector<16x128xf32>
    %3 = arith.mulf %0, %2 : vector<16x128xf32>
    %c0_3 = arith.constant 0 : index
    %c0_4 = arith.constant 0 : index
    %4 = vector.load %arg3[%c0_3, %c0_4] : memref<1x128xf32, #tpu.memory_space<vmem>>, vector<1x128xf32>
    %5 = vector.broadcast %4 : vector<1x128xf32> to vector<16x128xf32>
    %6 = arith.addf %3, %5 : vector<16x128xf32>
    %cst = arith.constant 0.000000e+00 : f32
    %7 = vector.broadcast %cst : f32 to vector<16x128xf32>
    %8 = arith.maximumf %6, %7 : vector<16x128xf32>
    %c0_5 = arith.constant 0 : index
    %c0_6 = arith.constant 0 : index
    %9 = vector.load %arg4[%c0_5, %c0_6] : memref<16x128xf32, #tpu.memory_space<vmem>>, vector<16x128xf32>
    tpu.vector_store %arg4[%c0_5, %c0_6], %8 {strides = array<i32>} : memref<16x128xf32, #tpu.memory_space<vmem>>, vector<16x128xf32>,
    return
  }
  func.func @transform_0(%arg0: i32) -> (i32, i32) {
    %c0_i32 = arith.constant 0 : i32
    %c0_i32_0 = arith.constant 0 : i32
    return %arg0, %c0_i32 : i32, i32
  }
  func.func @transform_1(%arg0: i32) -> (i32, i32) {
    %c0_i32 = arith.constant 0 : i32
    %c0_i32_0 = arith.constant 0 : i32
    %c0_i32_1 = arith.constant 0 : i32
    return %c0_i32, %c0_i32_0 : i32, i32
  }
  func.func @transform_2(%arg0: i32) -> (i32, i32) {
    %c0_i32 = arith.constant 0 : i32
    %c0_i32_0 = arith.constant 0 : i32
    %c0_i32_1 = arith.constant 0 : i32
    return %c0_i32, %c0_i32_0 : i32, i32
  }
  func.func @transform_3(%arg0: i32) -> (i32, i32) {
    %c0_i32 = arith.constant 0 : i32
    %c0_i32_0 = arith.constant 0 : i32
    return %arg0, %c0_i32 : i32, i32
  }
}

</mosaic_0001>

<bundles_post_ra>
// kernel: mul.4
= control target key start
LH: loop header
LB: loop body
LE: loop exit
PB: predicated region body
PF: predicated region fallthrough
CT: control target
= control target key end

     0   :  { %vm46_vm0 = vcmask 64512   ;;  %s184_s0 = inlined_call_operand.vmem [shape: f32[3,3,4,8], index: 0, kind: input, shape index: {}]   ;;  %s185_s1 = inlined_call_operand.vmem [shape: f32[36,8], index: 1, kind: output, shape index: {}]  }
   0x1   :  { %v95_v0 = vld [vmem:[%s184_s0 + $0x20] sm:$0xf]  ;;  %v96_v1 = vld [vmem:[%s184_s0 + $0x1c] sm:$0xf]  ;;  %v97_v2 = vld [vmem:[%s184_s0 + $0x18] sm:$0xf] }
   0x2   :  { %8 = vst [vmem:[#allocation0 + $0x40] sm:$0xf] %v95_v0  ;;  %13 = vst [vmem:[#allocation0 + $0x38] sm:$0xf] %v96_v1  ;;  %v98_v3 = vld [vmem:[%s184_s0 + $0x14] sm:$0xf] }
   0x3   :  { %18 = vst [vmem:[#allocation0 + $0x30] sm:$0xf] %v97_v2  ;;  %v99_v4 = vld [vmem:[%s184_s0 + $0x10] sm:$0xf]  ;;  %v100_v5 = vld [vmem:[%s184_s0 + $0xc] sm:$0xf] }
   0x4   :  { %23 = vst [vmem:[#allocation0 + $0x28] sm:$0xf] %v98_v3  ;;  %28 = vst [vmem:[#allocation0 + $0x20] sm:$0xf] %v99_v4  ;;  %v101_v6 = vld [vmem:[%s184_s0 + $0x8] sm:$0xf] }
   0x5   :  { %33 = vst [vmem:[#allocation0 + $0x18] sm:$0xf] %v100_v5  ;;  %v102_v7 = vld [vmem:[%s184_s0 + $0x4] sm:$0xf]  ;;  %v43_v8 = vld [vmem:[%s184_s0] sm:$0xf] }
   0x6   :  { %38 = vst [vmem:[#allocation0 + $0x10] sm:$0xf] %v101_v6  ;;  %42 = vst [vmem:[#allocation0 + $0x8] sm:$0xf] %v102_v7 }
   0x7   :  { %44 = vst [vmem:[#allocation0] sm:$0xf] %v43_v8 }
   0x9   :  { %v79_v10 = vld [vmem:[#allocation0 + $0x38] sm:$0xf]   ;;  %v84_v11 = vld [vmem:[#allocation0 + $0x40] sm:$0xf]  }
   0xa   :  { %v74_v9 = vld [vmem:[#allocation0 + $0x30] sm:$0xf]   ;;  %109 = vst.msk [vmem:[%s185_s1 + $0x1c] sm:$0xf] %vm46_vm0, %v79_v10   ;;  %110 = vst.msk [vmem:[%s185_s1 + $0x20] sm:$0xf] %vm46_vm0, %v84_v11  }
   0xb   :  { %v64_v13 = vld [vmem:[#allocation0 + $0x20] sm:$0xf]   ;;  %v69_v14 = vld [vmem:[#allocation0 + $0x28] sm:$0xf]   ;;  %108 = vst.msk [vmem:[%s185_s1 + $0x18] sm:$0xf] %vm46_vm0, %v74_v9  }
   0xc   :  { %v59_v12 = vld [vmem:[#allocation0 + $0x18] sm:$0xf]   ;;  %106 = vst.msk [vmem:[%s185_s1 + $0x10] sm:$0xf] %vm46_vm0, %v64_v13   ;;  %107 = vst.msk [vmem:[%s185_s1 + $0x14] sm:$0xf] %vm46_vm0, %v69_v14  }
   0xd   :  { %v49_v16 = vld [vmem:[#allocation0 + $0x8] sm:$0xf]   ;;  %v54_v17 = vld [vmem:[#allocation0 + $0x10] sm:$0xf]   ;;  %105 = vst.msk [vmem:[%s185_s1 + $0xc] sm:$0xf] %vm46_vm0, %v59_v12  }
   0xe   :  { %v45_v15 = vld [vmem:[#allocation0] sm:$0xf]   ;;  %103 = vst.msk [vmem:[%s185_s1 + $0x4] sm:$0xf] %vm46_vm0, %v49_v16   ;;  %104 = vst.msk [vmem:[%s185_s1 + $0x8] sm:$0xf] %vm46_vm0, %v54_v17  }
   0xf   :  { %47 = vst.msk [vmem:[%s185_s1] sm:$0xf] %vm46_vm0, %v45_v15  }

// kernel: tile.13
= control target key start
LH: loop header
LB: loop body
LE: loop exit
PB: predicated region body
PF: predicated region fallthrough
CT: control target
= control target key end

     0   :  { %s28_s0 = inlined_call_operand.vmem [shape: f32[8], index: 0, kind: input, shape index: {}]   ;;  %s29_s1 = inlined_call_operand.vmem [shape: f32[16,8], index: 1, kind: output, shape index: {}]  }
   0x1   :  { %v4_v0 = vld [vmem:[%s28_s0] ss:$0 sm:$0xff] }
   0x2   :  { %5 = vst [vmem:[%s29_s1] sm:$0xff] %v4_v0  ;;  %8 = vst [vmem:[%s29_s1 + $0x8] sm:$0xff] %v4_v0 }

// kernel: tile.14
= control target key start
LH: loop header
LB: loop body
LE: loop exit
PB: predicated region body
PF: predicated region fallthrough
CT: control target
= control target key end

     0   :  { %s131_s10 = smov 120   ;;  %s132_s11 = smov 104   ;;  %vm3_vm0 = vcmask 64512   ;;  %vm9_vm1 = vcmask 1048512   ;;  %vm15_vm2 = vcmask 982912   ;;  %vm21_vm3 = vcmask 917312   ;;  %s207_s0 = inlined_call_operand.vmem [shape: f32[16,8], index: 0, kind: input, shape index: {}]   ;;  %s208_s1 = inlined_call_operand.vmem [shape: f32[1,128], index: 1, kind: output, shape index: {}]  }
   0x1   :  { %v101_v0 = vld [vmem:[%s207_s0 + $0xf] sm:$0x1]   ;;  %v103_v1 = vld [vmem:[%s207_s0 + $0xd] sm:$0x1]   ;;  %v102_v2 = vld [vmem:[%s207_s0 + $0xe] sm:$0x1]  }
   0x2   :  { %7 = vrot.lane.b32.xlu0 %v101_v0, %s131_s10  ;;  %19 = vrot.lane.b32.xlu1 %v103_v1, %s132_s11  ;;  %v104_v3 = vld [vmem:[%s207_s0 + $0xc] sm:$0x1]   ;;  %s133_s16 = smov 112   ;;  %s134_s17 = smov 96   ;;  %v105_v4 = vld [vmem:[%s207_s0 + $0xb] sm:$0x1]  }
   0x3   :  { %v106_v5 = vld [vmem:[%s207_s0 + $0xa] sm:$0x1]   ;;  %v2_v6 = vld [vmem:[%s207_s0] sm:$0x1]   ;;  %s135_s24 = smov 88   ;;  %s136_s25 = smov 80  }
   0x4   :  { %4 = vst.msk [vmem:[#allocation0] sm:$0x1] %vm3_vm0, %v2_v6   ;;  %v107_v7 = vld [vmem:[%s207_s0 + $0x9] sm:$0x1]   ;;  %v108_v8 = vld [vmem:[%s207_s0 + $0x8] sm:$0x1]  }
   0x5   :  { %s137_s30 = smov 72   ;;  %s138_s2 = smov 64   ;;  %v109_v9 = vld [vmem:[%s207_s0 + $0x7] sm:$0x1]   ;;  %v110_v10 = vld [vmem:[%s207_s0 + $0x6] sm:$0x1]  }
   0x6   :  { %13 = vrot.lane.b32.xlu0 %v102_v2, %s133_s16  ;;  %25 = vrot.lane.b32.xlu1 %v104_v3, %s134_s17  ;;  %s139_s7 = smov 56   ;;  %s140_s8 = smov 48   ;;  %v111_v11 = vld [vmem:[%s207_s0 + $0x5] sm:$0x1]   ;;  %v112_v12 = vld [vmem:[%s207_s0 + $0x4] sm:$0x1]  }
   0x7   :  { %s141_s13 = smov 40   ;;  %s142_s14 = smov 32   ;;  %v113_v13 = vld [vmem:[%s207_s0 + $0x3] sm:$0x1]   ;;  %v114_v14 = vld [vmem:[%s207_s0 + $0x2] sm:$0x1]  }
   0x8   :  { %s143_s19 = smov 24   ;;  %s144_s20 = smov 16   ;;  %v115_v15 = vld [vmem:[%s207_s0 + $0x1] sm:$0x1]   ;;  %vm27_vm4 = vcmask 851712   ;;  %vm33_vm5 = vcmask 786112  }
   0x9   :  { %s145_s0 = smov 8   ;;  %vm39_vm6 = vcmask 720512   ;;  %vm45_vm7 = vcmask 654912   ;;  %vm51_vm8 = vcmask 589312   ;;  %vm57_vm9 = vcmask 523712  }
   0xa   :  { %31 = vrot.lane.b32.xlu0 %v105_v4, %s135_s24  ;;  %37 = vrot.lane.b32.xlu1 %v106_v5, %s136_s25  ;;  %vm63_vm10 = vcmask 458112   ;;  %vm69_vm11 = vcmask 392512   ;;  %vm75_vm12 = vcmask 326912   ;;  %vm81_vm13 = vcmask 261312  }
   0xb   :  { %vm87_vm14 = vcmask 195712   ;;  %vm93_vm15 = vcmask 130112  }
   0xe   :  { %43 = vrot.lane.b32.xlu0 %v107_v7, %s137_s30  ;;  %49 = vrot.lane.b32.xlu1 %v108_v8, %s138_s2 }
  0x12   :  { %55 = vrot.lane.b32.xlu0 %v109_v9, %s139_s7  ;;  %61 = vrot.lane.b32.xlu1 %v110_v10, %s140_s8 }
  0x16   :  { %67 = vrot.lane.b32.xlu0 %v111_v11, %s141_s13  ;;  %73 = vrot.lane.b32.xlu1 %v112_v12, %s142_s14 }
  0x1a   :  { %79 = vrot.lane.b32.xlu0 %v113_v13, %s143_s19  ;;  %85 = vrot.lane.b32.xlu1 %v114_v14, %s144_s20 }
  0x1e   :  { %91 = vrot.lane.b32.xlu0 %v115_v15, %s145_s0 }
  0x74   :  { %v8_v16 = vpop.permute.xlu0 %7   ;;  %v20_v17 = vpop.permute.xlu1 %19  }
  0x75   :  { %10 = vst.msk [vmem:[#allocation0] sm:$0x1] %vm9_vm1, %v8_v16  }
  0x78   :  { %v14_v18 = vpop.permute.xlu0 %13   ;;  %v26_v19 = vpop.permute.xlu1 %25  }
  0x79   :  { %16 = vst.msk [vmem:[#allocation0] sm:$0x1] %vm15_vm2, %v14_v18  }
  0x7a   :  { %22 = vst.msk [vmem:[#allocation0] sm:$0x1] %vm21_vm3, %v20_v17  }
  0x7b   :  { %28 = vst.msk [vmem:[#allocation0] sm:$0x1] %vm27_vm4, %v26_v19  }
  0x7c   :  { %v32_v20 = vpop.permute.xlu0 %31   ;;  %v38_v21 = vpop.permute.xlu1 %37  }
  0x7d   :  { %34 = vst.msk [vmem:[#allocation0] sm:$0x1] %vm33_vm5, %v32_v20  }
  0x7e   :  { %40 = vst.msk [vmem:[#allocation0] sm:$0x1] %vm39_vm6, %v38_v21  }
  0x80   :  { %v44_v22 = vpop.permute.xlu0 %43   ;;  %v50_v23 = vpop.permute.xlu1 %49  }
  0x81   :  { %46 = vst.msk [vmem:[#allocation0] sm:$0x1] %vm45_vm7, %v44_v22  }
  0x82   :  { %52 = vst.msk [vmem:[#allocation0] sm:$0x1] %vm51_vm8, %v50_v23  }
  0x84   :  { %v56_v24 = vpop.permute.xlu0 %55   ;;  %v62_v25 = vpop.permute.xlu1 %61  }
  0x85   :  { %58 = vst.msk [vmem:[#allocation0] sm:$0x1] %vm57_vm9, %v56_v24  }
  0x86   :  { %64 = vst.msk [vmem:[#allocation0] sm:$0x1] %vm63_vm10, %v62_v25  }
  0x88   :  { %v68_v26 = vpop.permute.xlu0 %67   ;;  %v74_v27 = vpop.permute.xlu1 %73  }
  0x89   :  { %70 = vst.msk [vmem:[#allocation0] sm:$0x1] %vm69_vm11, %v68_v26  }
  0x8a   :  { %76 = vst.msk [vmem:[#allocation0] sm:$0x1] %vm75_vm12, %v74_v27  }
  0x8c   :  { %v80_v28 = vpop.permute.xlu0 %79   ;;  %v86_v29 = vpop.permute.xlu1 %85  }
  0x8d   :  { %82 = vst.msk [vmem:[#allocation0] sm:$0x1] %vm81_vm13, %v80_v28  }
  0x8e   :  { %88 = vst.msk [vmem:[#allocation0] sm:$0x1] %vm87_vm14, %v86_v29  }
  0x90   :  { %v92_v30 = vpop.permute.xlu0 %91  }
  0x91   :  { %94 = vst.msk [vmem:[#allocation0] sm:$0x1] %vm93_vm15, %v92_v30  }
  0x98   :  { %v98_v31 = vld [vmem:[#allocation0] sm:$0x1] }
  0x99   :  { %100 = vst [vmem:[%s208_s1] sm:$0x1] %v98_v31 }

// kernel: conv_block.3
= control target key start
LH: loop header
LB: loop body
LE: loop exit
PB: predicated region body
PF: predicated region fallthrough
CT: control target
= control target key end

     0   :  { %s303_s12 = smov 0   ;;  %s320_s0 = inlined_call_operand.vmem [shape: f32[32,128], index: 0, kind: input, shape index: {}]   ;;  %s321_s1 = inlined_call_operand.vmem [shape: f32[1,128], index: 1, kind: input, shape index: {}]   ;;  %s322_s2 = inlined_call_operand.vmem [shape: f32[1,128], index: 2, kind: input, shape index: {}]   ;;  %s323_s3 = inlined_call_operand.vmem [shape: f32[32,128], index: 3, kind: output, shape index: {}]  }
   0x1 LB: > { %s254_s13 = sadd.s32 4294967295, %s281_s12   ;;  %p258_p0 = scmp.ge.s32.totalorder %s281_s12, 1  ;;  %s281_s12 = sphi %s303_s12, %s13_s12  }
   0x2   : > { %p138_p1 = scmp.lt.s32.totalorder %s281_s12, 3 }
   0x4   : > { %p139_p2 = pnand %p258_p0, %p138_p1 }
   0x5   : > { %s259_s14 = sshll.u32 (!%p139_p2), %s254_s13, 1  ;;  %v263_v0 = vld [vmem:[%s321_s1] ss:$0 sm:$0xff] (!%p139_p2) }
   0x6   : > { %142 = sbr.rel (%p139_p2) target bundleno = 24 (0x18), region = 32  ;;  %p163_p3 = scmp.lt.s32.totalorder (!%p139_p2), %s259_s14, 3  ;;  %v264_v3 = vld [vmem:[%s322_s2] ss:$0 sm:$0xff] (!%p139_p2) }
   0xd   : > { %s325_s14 = smov (!%p163_p3, %s259_s14), 3 }
   0xe   : > { %s260_s15 = sshll.u32 %s325_s14, 3 }
   0xf   : > { %s166_s20 = scalar_lea.vmem %s320_s0, %s260_s15  ;;  %s172_s25 = scalar_lea.vmem %s323_s3, %s260_s15 }
  0x10   : > { %v174_v1 = vld [vmem:[%s166_s20] sm:$0xff]  ;;  %v175_v2 = vld [vmem:[%s166_s20 + $0x8] sm:$0xff] }
  0x11   : > { %v183_v4 = vmul.f32 %v263_v0, %v174_v1  ;;  %v184_v5 = vmul.f32 %v263_v0, %v175_v2 }
  0x13   : > { %v192_v6 = vadd.f32 %v264_v3, %v183_v4  ;;  %v193_v7 = vadd.f32 %v264_v3, %v184_v5 }
  0x15   : > { %v194_v8 = vmax.f32 %v192_v6, 0.0  ;;  %v195_v9 = vmax.f32 %v193_v7, 0.0 }
  0x17   : > { %196 = vst [vmem:[%s172_s25] sm:$0xff] %v194_v8  ;;  %197 = vst [vmem:[%s172_s25 + $0x8] sm:$0xff] %v195_v9 }
  0x18 PF: > { %s13_s12 = sadd.s32 1, %s281_s12  }
  0x19   : > { %p10_p4 = scmp.ge.s32.totalorder %s13_s12, 4  }
  0x1b   :  { %12 = sbr.rel (!%p10_p4) target bundleno = 1 (0x1), region = 62 }

// kernel: conv_block.2
= control target key start
LH: loop header
LB: loop body
LE: loop exit
PB: predicated region body
PF: predicated region fallthrough
CT: control target
= control target key end

     0   :  { %s846_s12 = smov 0   ;;  %s1113_s0 = inlined_call_operand.vmem [shape: f32[32,576], index: 0, kind: input, shape index: {}]   ;;  %s1114_s1 = inlined_call_operand.vmem [shape: f32[576,128], index: 1, kind: input, shape index: {}]   ;;  %s1115_s2 = inlined_call_operand.vmem [shape: f32[32,128], index: 2, kind: output, shape index: {0}]   ;;  %s1116_s3 = inlined_call_operand.vmem [shape: f32[2,2,128], index: 3, kind: output, shape index: {1}]  }
   0x1 LB: > { %s852_s13 = sadd.s32 4294967295, %s824_s12   ;;  %p614_p0 = scmp.ge.s32.totalorder %s824_s12, 1  ;;  %s824_s12 = sphi %s846_s12, %s14_s12  }
   0x2   : > { %p142_p1 = scmp.lt.s32.totalorder %s824_s12, 3 }
   0x4   : > { %p143_p2 = pnand %p614_p0, %p142_p1 }
   0x5   : > { %v214_v0 = vld [vmem:[%s1114_s1 + $0x80] sm:$0xff] (!%p143_p2)  ;;  %v215_v1 = vld [vmem:[%s1114_s1 + $0x88] sm:$0xff] (!%p143_p2)  ;;  %v216_v11 = vld [vmem:[%s1114_s1 + $0x90] sm:$0xff] (!%p143_p2)  ;;  %s615_s11 = sshll.u32 (!%p143_p2), %s852_s13, 1  ;;  %vm270_vm0 = vcmask (!%p143_p2), 523264   ;;  %p184_p4 = scmp.lt.s32.totalorder (!%p143_p2), %s852_s13, 1 }
   0x6   : > { %146 = sbr.rel (%p143_p2) target bundleno = 290 (0x122), region = 28  ;;  %v246_v2 = vld [vmem:[%s1114_s1 + $0x180] sm:$0xff] (!%p143_p2)  ;;  %v729_v3 = vpack.c.bf16 (!%p143_p2), %v215_v1, %v214_v0  ;;  %v247_v4 = vld [vmem:[%s1114_s1 + $0x188] sm:$0xff] (!%p143_p2)  ;;  %v217_v13 = vld [vmem:[%s1114_s1 + $0x98] sm:$0xff] (!%p143_p2)  ;;  %p922_p3 = scmp.lt.s32.totalorder (!%p143_p2), %s615_s11, 3  ;;  %vm520_vm1 = vcmask (!%p143_p2), 1040384  }
   0x7   : > { %v198_v5 = vld [vmem:[%s1114_s1] sm:$0xff] (!%p143_p2)  ;;  %v199_v6 = vld [vmem:[%s1114_s1 + $0x8] sm:$0xff] (!%p143_p2)  ;;  %v761_v7 = vpack.c.bf16 (!%p143_p2), %v247_v4, %v246_v2  ;;  %v248_v14 = vld [vmem:[%s1114_s1 + $0x190] sm:$0xff] (!%p143_p2)  ;;  %v733_v16 = vpack.c.bf16 (!%p143_p2), %v217_v13, %v216_v11 }
   0x8   : > { %v731_v8 = vpack.c.bf16 (!%p143_p2), %v199_v6, %v198_v5  ;;  %v230_v9 = vld [vmem:[%s1114_s1 + $0x100] sm:$0xff] (!%p143_p2)  ;;  %v231_v10 = vld [vmem:[%s1114_s1 + $0x108] sm:$0xff] (!%p143_p2)  ;;  %730 = vmatprep.subr.bf16.mxu0 (!%p143_p2), %v729_v3  ;;  %v249_v15 = vld [vmem:[%s1114_s1 + $0x198] sm:$0xff] (!%p143_p2) }
   0x9   : > { %v763_v12 = vpack.c.bf16 (!%p143_p2), %v231_v10, %v230_v9  ;;  %762 = vmatprep.subr.bf16.mxu1 (!%p143_p2), %v761_v7  ;;  %v765_v17 = vpack.c.bf16 (!%p143_p2), %v249_v15, %v248_v14  ;;  %v200_v18 = vld [vmem:[%s1114_s1 + $0x10] sm:$0xff] (!%p143_p2)  ;;  %v201_v19 = vld [vmem:[%s1114_s1 + $0x18] sm:$0xff] (!%p143_p2)  ;;  %v218_v23 = vld [vmem:[%s1114_s1 + $0xa0] sm:$0xff] (!%p143_p2) }
   0xa   : > { %732 = vmatpush3.bf16.msra.mxu0 (!%p143_p2), %v731_v8  ;;  %v232_v20 = vld [vmem:[%s1114_s1 + $0x110] sm:$0xff] (!%p143_p2)  ;;  %v735_v21 = vpack.c.bf16 (!%p143_p2), %v201_v19, %v200_v18  ;;  %v233_v22 = vld [vmem:[%s1114_s1 + $0x118] sm:$0xff] (!%p143_p2)  ;;  %v219_v24 = vld [vmem:[%s1114_s1 + $0xa8] sm:$0xff] (!%p143_p2) }
   0xb   : > { %764 = vmatpush3.bf16.msra.mxu1 (!%p143_p2), %v763_v12  ;;  %734 = vmatprep.subr.bf16.mxu0 (!%p143_p2), %v733_v16  ;;  %v767_v25 = vpack.c.bf16 (!%p143_p2), %v233_v22, %v232_v20  ;;  %v737_v26 = vpack.c.bf16 (!%p143_p2), %v219_v24, %v218_v23  ;;  %v250_v27 = vld [vmem:[%s1114_s1 + $0x1a0] sm:$0xff] (!%p143_p2)  ;;  %v251_v28 = vld [vmem:[%s1114_s1 + $0x1a8] sm:$0xff] (!%p143_p2)  ;;  %v220_v35 = vld [vmem:[%s1114_s1 + $0xb0] sm:$0xff] (!%p143_p2) }
   0xc   : > { %766 = vmatprep.subr.bf16.mxu1 (!%p143_p2), %v765_v17  ;;  %v202_v29 = vld [vmem:[%s1114_s1 + $0x20] sm:$0xff] (!%p143_p2)  ;;  %v769_v30 = vpack.c.bf16 (!%p143_p2), %v251_v28, %v250_v27  ;;  %v203_v31 = vld [vmem:[%s1114_s1 + $0x28] sm:$0xff] (!%p143_p2)  ;;  %v221_v36 = vld [vmem:[%s1114_s1 + $0xb8] sm:$0xff] (!%p143_p2) }
   0xd   : > { %v234_v32 = vld [vmem:[%s1114_s1 + $0x120] sm:$0xff]  ;;  %v235_v33 = vld [vmem:[%s1114_s1 + $0x128] sm:$0xff]  ;;  %v739_v34 = vpack.c.bf16 %v203_v31, %v202_v29  ;;  %v252_v37 = vld [vmem:[%s1114_s1 + $0x1b0] sm:$0xff]  ;;  %v741_v39 = vpack.c.bf16 %v221_v36, %v220_v35  ;;  %s1119_s11 = smov (!%p922_p3, %s615_s11), 3  ;;  %s1121_s13 = smov (!%p184_p4, %s852_s13), 1 }
   0xe   : > { %736 = vmatpush3.bf16.msra.mxu0 %v735_v21  ;;  %v771_v38 = vpack.c.bf16 %v235_v33, %v234_v32  ;;  %v253_v40 = vld [vmem:[%s1114_s1 + $0x1b8] sm:$0xff]  ;;  %v204_v41 = vld [vmem:[%s1114_s1 + $0x30] sm:$0xff]  ;;  %v222_v46 = vld [vmem:[%s1114_s1 + $0xc0] sm:$0xff]  ;;  %s809_s27 = smul.u32 40, %s1119_s11  ;;  %s618_s20 = sshll.u32 %s1119_s11, 3 }
   0xf   : > { %768 = vmatpush3.bf16.msra.mxu1 %v767_v25  ;;  %738 = vmatprep.subr.bf16.mxu0 %v737_v26  ;;  %v205_v42 = vld [vmem:[%s1114_s1 + $0x38] sm:$0xff]  ;;  %v773_v43 = vpack.c.bf16 %v253_v40, %v252_v37  ;;  %v236_v44 = vld [vmem:[%s1114_s1 + $0x130] sm:$0xff]  ;;  %v223_v47 = vld [vmem:[%s1114_s1 + $0xc8] sm:$0xff]  ;;  %s182_s23 = scalar_lea.vmem %s1115_s2, %s618_s20  ;;  %s619_s11 = sshll.u32 %s1121_s13, 1 }
  0x10   : > { %770 = vmatprep.subr.bf16.mxu1 %v769_v30  ;;  %v237_v45 = vld [vmem:[%s1114_s1 + $0x138] sm:$0xff]  ;;  %v254_v48 = vld [vmem:[%s1114_s1 + $0x1c0] sm:$0xff]  ;;  %v255_v49 = vld [vmem:[%s1114_s1 + $0x1c8] sm:$0xff]  ;;  %v743_v50 = vpack.c.bf16 %v205_v42, %v204_v41  ;;  %v745_v52 = vpack.c.bf16 %v223_v47, %v222_v46  ;;  %s1023_s22 = scalar_lea.vmem %s1113_s0, %s809_s27  ;;  %s187_s26 = scalar_lea.vmem %s1116_s3, %s619_s11 }
  0x11   : > { %v775_v51 = vpack.c.bf16 %v237_v45, %v236_v44  ;;  %v206_v53 = vld [vmem:[%s1114_s1 + $0x40] sm:$0xff]  ;;  %v207_v54 = vld [vmem:[%s1114_s1 + $0x48] sm:$0xff]  ;;  %v777_v56 = vpack.c.bf16 %v255_v49, %v254_v48  ;;  %v224_v58 = vld [vmem:[%s1114_s1 + $0xd0] sm:$0xff] }
  0x12   : > { %740 = vmatpush3.bf16.msra.mxu0 %v739_v34  ;;  %v238_v55 = vld [vmem:[%s1114_s1 + $0x140] sm:$0xff]  ;;  %v239_v57 = vld [vmem:[%s1114_s1 + $0x148] sm:$0xff]  ;;  %v225_v59 = vld [vmem:[%s1114_s1 + $0xd8] sm:$0xff]  ;;  %v747_v62 = vpack.c.bf16 %v207_v54, %v206_v53 }
  0x13   : > { %772 = vmatpush3.bf16.msra.mxu1 %v771_v38  ;;  %742 = vmatprep.subr.bf16.mxu0 %v741_v39  ;;  %v256_v60 = vld [vmem:[%s1114_s1 + $0x1d0] sm:$0xff]  ;;  %v257_v61 = vld [vmem:[%s1114_s1 + $0x1d8] sm:$0xff]  ;;  %v779_v63 = vpack.c.bf16 %v239_v57, %v238_v55  ;;  %v749_v0 = vpack.c.bf16 %v225_v59, %v224_v58  ;;  %v226_v6 = vld [vmem:[%s1114_s1 + $0xe0] sm:$0xff] }
  0x14   : > { %774 = vmatprep.subr.bf16.mxu1 %v773_v43  ;;  %v208_v1 = vld [vmem:[%s1114_s1 + $0x50] sm:$0xff]  ;;  %v209_v2 = vld [vmem:[%s1114_s1 + $0x58] sm:$0xff]  ;;  %v781_v4 = vpack.c.bf16 %v257_v61, %v256_v60  ;;  %v227_v7 = vld [vmem:[%s1114_s1 + $0xe8] sm:$0xff] }
  0x15   : > { %v240_v3 = vld [vmem:[%s1114_s1 + $0x150] sm:$0xff]  ;;  %v241_v5 = vld [vmem:[%s1114_s1 + $0x158] sm:$0xff]  ;;  %v258_v8 = vld [vmem:[%s1114_s1 + $0x1e0] sm:$0xff]  ;;  %v751_v10 = vpack.c.bf16 %v209_v2, %v208_v1  ;;  %v753_v14 = vpack.c.bf16 %v227_v7, %v226_v6 }
  0x16   : > { %744 = vmatpush3.bf16.msra.mxu0 %v743_v50  ;;  %v259_v9 = vld [vmem:[%s1114_s1 + $0x1e8] sm:$0xff]  ;;  %v210_v11 = vld [vmem:[%s1114_s1 + $0x60] sm:$0xff]  ;;  %v783_v13 = vpack.c.bf16 %v241_v5, %v240_v3  ;;  %v191_v17 = vld [vmem:[%s1023_s22 + $0x18] sm:$0xff] }
  0x17   : > { %776 = vmatpush3.bf16.msra.mxu1 %v775_v51  ;;  %746 = vmatprep.subr.bf16.mxu0 %v745_v52  ;;  %v211_v12 = vld [vmem:[%s1114_s1 + $0x68] sm:$0xff]  ;;  %v242_v15 = vld [vmem:[%s1114_s1 + $0x160] sm:$0xff]  ;;  %v785_v18 = vpack.c.bf16 %v259_v9, %v258_v8  ;;  %v228_v20 = vld [vmem:[%s1114_s1 + $0xf0] sm:$0xff] }
  0x18   : > { %778 = vmatprep.subr.bf16.mxu1 %v777_v56  ;;  %v189_v16 = vld [vmem:[%s1023_s22 + $0x8] sm:$0xff]  ;;  %v229_v21 = vld [vmem:[%s1114_s1 + $0xf8] sm:$0xff]  ;;  %v260_v22 = vld [vmem:[%s1114_s1 + $0x1f0] sm:$0xff]  ;;  %416 = vmatprep.mubr.f32.mxu1 %v191_v17  ;;  %v755_v24 = vpack.c.bf16 %v211_v12, %v210_v11 }
  0x19   : > { %v243_v19 = vld [vmem:[%s1114_s1 + $0x168] sm:$0xff]  ;;  %341 = vmatprep.mubr.f32.mxu0 %v189_v16  ;;  %v261_v23 = vld [vmem:[%s1114_s1 + $0x1f8] sm:$0xff]  ;;  %v757_v26 = vpack.c.bf16 %v229_v21, %v228_v20  ;;  %v212_v27 = vld [vmem:[%s1114_s1 + $0x70] sm:$0xff] }
  0x1a   : > { %748 = vmatpush3.bf16.msra.mxu0 %v747_v62  ;;  %v787_v25 = vpack.c.bf16 %v243_v19, %v242_v15  ;;  %v213_v28 = vld [vmem:[%s1114_s1 + $0x78] sm:$0xff]  ;;  %v244_v29 = vld [vmem:[%s1114_s1 + $0x170] sm:$0xff]  ;;  %v789_v30 = vpack.c.bf16 %v261_v23, %v260_v22  ;;  %v262_v32 = vld [vmem:[%s1114_s1 + $0x200] sm:$0xff] }
  0x1b   : > { %780 = vmatpush3.bf16.msra.mxu1 %v779_v63  ;;  %750 = vmatprep.subr.bf16.mxu0 %v749_v0  ;;  %v245_v31 = vld [vmem:[%s1114_s1 + $0x178] sm:$0xff]  ;;  %v263_v33 = vld [vmem:[%s1114_s1 + $0x208] sm:$0xff]  ;;  %v759_v34 = vpack.c.bf16 %v213_v28, %v212_v27  ;;  %v264_v37 = vld [vmem:[%s1114_s1 + $0x210] sm:$0xff] }
  0x1c   : > { %782 = vmatprep.subr.bf16.mxu1 %v781_v4  ;;  %v791_v35 = vpack.c.bf16 %v245_v31, %v244_v29  ;;  %v793_v36 = vpack.c.bf16 %v263_v33, %v262_v32  ;;  %v265_v38 = vld [vmem:[%s1114_s1 + $0x218] sm:$0xff]  ;;  %v188_v39 = vld [vmem:[%s1023_s22] sm:$0xff]  ;;  %v190_v40 = vld [vmem:[%s1023_s22 + $0x10] sm:$0xff] }
  0x1d   : > { %v797_v41 = vpack.c.bf16 %v265_v38, %v264_v37  ;;  %v266_v42 = vld [vmem:[%s1114_s1 + $0x220] sm:$0xff]  ;;  %v267_v43 = vld [vmem:[%s1114_s1 + $0x228] sm:$0xff]  ;;  %v194_v44 = vld [vmem:[%s1023_s22 + $0x30] sm:$0xff] }
  0x1e   : > { %752 = vmatpush3.bf16.msra.mxu0 %v751_v10  ;;  %v196_v45 = vld [vmem:[%s1023_s22 + $0x40] sm:$0xff]  ;;  %v193_v46 = vld [vmem:[%s1023_s22 + $0x28] sm:$0xff]  ;;  %v801_v47 = vpack.c.bf16 %v267_v43, %v266_v42  ;;  %v195_v48 = vld [vmem:[%s1023_s22 + $0x38] sm:$0xff] }
  0x1f   : > { %784 = vmatpush3.bf16.msra.mxu1 %v783_v13  ;;  %754 = vmatprep.subr.bf16.mxu0 %v753_v14  ;;  %v268_v49 = vld [vmem:[%s1114_s1 + $0x230] sm:$0xff]  ;;  %v269_v50 = vld [vmem:[%s1114_s1 + $0x238] sm:$0xff]  ;;  %v192_v51 = vld [vmem:[%s1023_s22 + $0x20] sm:$0xff] }
  0x20   : > { %786 = vmatprep.subr.bf16.mxu1 %v785_v18  ;;  %v805_v52 = vpack.c.bf16 %v269_v50, %v268_v49  ;;  %v197_v53 = vld [vmem:[%s1023_s22 + $0x48] sm:$0xff] }
  0x22   : > { %756 = vmatpush3.bf16.msra.mxu0 %v755_v24 }
  0x23   : > { %788 = vmatpush3.bf16.msra.mxu1 %v787_v25  ;;  %758 = vmatprep.subr.bf16.mxu0 %v757_v26 }
  0x24   : > { %790 = vmatprep.subr.bf16.mxu1 %v789_v30 }
  0x26   : > { %760 = vmatpush3.bf16.msra.mxu0 %v759_v34 }
  0x27   : > { %792 = vmatpush3.bf16.msra.mxu1 %v791_v35  ;;  %794 = vmatprep.subr.bf16.mxu0 %v793_v36 }
  0x29   : > { %342 = vmatmul.mubr.f32.vlgmr.msra.gmra.mrb[0].mxu0 %v188_v39 }
  0x2a   : > { %417 = vmatmul.mubr.f32.vlgmr.msra.gmra.mrb[0].mxu1 %v190_v40  ;;  %796 = vmatpush3.bf16.msra.mxu0 %v793_v36 }
  0x2b   : > { %798 = vmatprep.subr.bf16.mxu0 %v797_v41  ;;  %346 = vmatprep.mubr.f32.mxu0 %v194_v44 }
  0x2c   : > { %421 = vmatprep.mubr.f32.mxu1 %v196_v45 }
  0x2d   : > { %347 = vmatmul.mubr.f32.gmra.mrb[2].mxu0 %v193_v46 }
  0x2e   : > { %800 = vmatpush3.bf16.msra.mxu0 %v797_v41  ;;  %422 = vmatmul.mubr.f32.gmra.mrb[2].mxu1 %v195_v48 }
  0x2f   : > { %802 = vmatprep.subr.bf16.mxu0 %v801_v47  ;;  %726 = vmatprep.mubr.msk.f32.mxu0 %vm270_vm0, %v192_v51 }
  0x32   : > { %804 = vmatpush3.bf16.msra.mxu0 %v801_v47 }
  0x33   : > { %806 = vmatprep.subr.bf16.mxu0 %v805_v52 }
  0x36   : > { %808 = vmatpush3.bf16.msra.mxu0 %v805_v52 }
  0x39   : > { %727 = vmatmul.mubr.msk.f32.vlgmr.msra.gmra.mrb[4].mxu0 %vm270_vm0, %v197_v53 }
  0xfc   : > { %v656_v54 = vpop.f32.mrb[0].mxu0 }
  0xfd   : > { %v694_v55 = vpop.f32.mrb[0].mxu1  ;;  %v657_v56 = vpop.f32.mrb[1].mxu0 }
  0xfe   : > { %v658_v57 = vadd.f32 %v657_v56, %v656_v54  ;;  %v695_v58 = vpop.f32.mrb[1].mxu1 }
  0xff   : > { %v696_v59 = vadd.f32 %v695_v58, %v694_v55 }
 0x100   : > { %v659_v60 = vpop.f32.mrb[2].mxu0 }
 0x101   : > { %v697_v61 = vpop.f32.mrb[2].mxu1  ;;  %v660_v62 = vpop.f32.mrb[3].mxu0  ;;  %v419_v63 = vadd.f32 %v696_v59, %v658_v57 }
 0x102   : > { %v661_v0 = vadd.f32 %v660_v62, %v659_v60  ;;  %v698_v1 = vpop.f32.mrb[3].mxu1 }
 0x103   : > { %v699_v2 = vadd.f32 %v698_v1, %v697_v61 }
 0x105   : > { %v424_v3 = vadd.f32 %v699_v2, %v661_v0 }
 0x10c   : > { %v728_v4 = vpop.f32.mrb[4].mxu0 }
 0x10d   : > { %v499_v5 = vadd.f32 %v728_v4, %v424_v3  ;;  %v493_v6 = vpop.f32.mrb[5].mxu0 }
 0x10e   : > { %v494_v7 = vadd.f32 %v493_v6, %v419_v63 }
 0x10f   : > { %v512_v8 = vmul.f32 %v499_v5, %v499_v5  ;;  %503 = vst [vmem:[%s182_s23 + $0x8] sm:$0xff] %v499_v5 }
 0x110   : > { %502 = vst [vmem:[%s182_s23] sm:$0xff] %v494_v7  ;;  %v504_v9 = vadd.f32 %v499_v5, %v494_v7  ;;  %v511_v10 = vmul.f32 %v494_v7, %v494_v7 }
 0x112   : > { %v505_v11 = vrot.slane %v504_v9, 4  ;;  %v513_v12 = vadd.f32 %v512_v8, %v511_v10 }
 0x114   : > { %v506_v13 = vadd.f32 %v505_v11, %v504_v9  ;;  %v514_v14 = vrot.slane %v513_v12, 4 }
 0x116   : > { %v507_v15 = vrot.slane %v506_v13, 2  ;;  %v515_v16 = vadd.f32 %v514_v14, %v513_v12 }
 0x118   : > { %v508_v17 = vadd.f32 %v507_v15, %v506_v13  ;;  %v516_v18 = vrot.slane %v515_v16, 2 }
 0x11a   : > { %v509_v19 = vrot.slane %v508_v17, 1  ;;  %v517_v20 = vadd.f32 %v516_v18, %v515_v16 }
 0x11c   : > { %v518_v21 = vrot.slane %v517_v20, 1  ;;  %v510_v22 = vadd.f32 %v509_v19, %v508_v17 }
 0x11e   : > { %v519_v23 = vadd.f32 %v518_v21, %v517_v20 }
 0x120   : > { %v521_v24 = vsel %vm520_vm1, %v510_v22, %v519_v23 }
 0x121   : > { %522 = vst [vmem:[%s187_s26] sm:$0x3] %v521_v24 }
 0x122 PF: > { %s14_s12 = sadd.s32 1, %s824_s12  }
 0x123   : > { %p11_p5 = scmp.ge.s32.totalorder %s14_s12, 4  }
 0x125   :  { %13 = sbr.rel (!%p11_p5) target bundleno = 1 (0x1), region = 70 }

</bundles_post_ra>
